<compile_context>
chip_gen: v7x
topology: tpu7x:2x2x1
jax: 0.10.0
libtpu: 0.0.40
codegen_flags: <defaults>
</compile_context>

<pallas_src>
import jax
import jax.numpy as jnp
from jax.experimental import pallas as pl
from jax.experimental.pallas import tpu as pltpu


def _round_up(n, m):
    return -(-n // m) * m


def _mlp2_kernel(x_ref, w1_ref, b_ref, w2_ref, o_ref):
    # In-kernel cast of the streaming x tile to bf16 (no-op if already bf16);
    # this is VPU work hidden under MXU slack, not an extra HBM pass.
    x = x_ref[...].astype(w1_ref.dtype)
    # Layer 1: bf16 x bf16 on the MXU, f32 accumulation.
    h = jnp.dot(x, w1_ref[...], preferred_element_type=jnp.float32)
    # Bias add + ReLU in f32 (avoids bf16 VPU lowering penalties on v5e).
    h = jnp.maximum(h + b_ref[0:1, :], 0.0)
    # Layer 2: re-cast the activation to bf16 for the second MXU pass.
    y = jnp.dot(h.astype(w2_ref.dtype), w2_ref[...],
                preferred_element_type=jnp.float32)
    y = jnp.maximum(y + b_ref[1:2, :], 0.0)
    o_ref[...] = y.astype(o_ref.dtype)


def advanced_audio_encoder(x, w1, b1, w2, b2, *, block_b=None, out_dtype=None):
    """x: (B, D_in); w1: (D_in, H); b1: (1, H); w2: (H, H); b2: (1, H).

    Computes relu(relu(x @ w1 + b1) @ w2 + b2) — the forward pass of
    AdvancedAudioEncoder with audio_layers=2. Compute is bf16 on the MXU with
    f32 accumulation; out_dtype defaults to x.dtype.
    """
    B, D_in = x.shape
    H = w1.shape[1]
    if out_dtype is None:
        out_dtype = x.dtype

    x_item = jnp.dtype(x.dtype).itemsize
    out_item = jnp.dtype(out_dtype).itemsize
    # bf16 packs 2 rows per sublane (one vreg = [16,128]); keep bf16 tiles
    # 16-row aligned to avoid half-packed vregs / masked sublane stores.
    align = 16 if min(x_item, out_item) < 4 else 8

    if block_b is None:
        # Sweepable cap. Per-row footprint is (D_in + H) elements, so even
        # 4096-row double-buffered tiles are a few MiB — fine on every
        # generation (incl. v5e's 16 MiB default scoped VMEM).
        cap = 4096
        # v7x has 2 TensorCores; the "parallel" batch axis is the only thing
        # that shards across them, so keep >= 2 grid steps when B is large.
        per_core = _round_up(pl.cdiv(B, 2), align)
        block_b = max(align, min(cap, per_core))
    block_b = max(align, min(_round_up(block_b, align), _round_up(B, align)))

    # Weights/biases are tiny and VMEM-resident: cast once here (ideally they
    # would be stored bf16 offline). Biases packed into one (2, H) f32 input.
    w1_bf = w1.astype(jnp.bfloat16)
    w2_bf = w2.astype(jnp.bfloat16)
    b_packed = jnp.concatenate(
        [b1.reshape(1, H), b2.reshape(1, H)], axis=0).astype(jnp.float32)

    grid = (pl.cdiv(B, block_b),)

    weight_bytes = (D_in * H + H * H) * 2 + 2 * H * 4
    stream_bytes = B * (D_in * x_item + H * out_item)
    cost = pl.CostEstimate(
        flops=2 * B * (D_in * H + H * H),
        transcendentals=0,
        bytes_accessed=stream_bytes + weight_bytes,
    )

    # Only raise the scoped-VMEM limit if a caller-chosen huge tile needs it
    # (relevant on v5e, whose default scoped VMEM is 16 MiB).
    tile_bytes = block_b * (D_in * x_item + H * out_item)
    # double-buffered streaming tiles + resident weights + f32 intermediate.
    vmem_needed = 2 * tile_bytes + weight_bytes + block_b * H * 4
    compiler_kwargs = dict(dimension_semantics=("parallel",))
    if vmem_needed > 12 * 1024 * 1024:
        compiler_kwargs["vmem_limit_bytes"] = min(
            int(vmem_needed * 1.5) + (2 << 20), 64 * 1024 * 1024)

    return pl.pallas_call(
        _mlp2_kernel,
        out_shape=jax.ShapeDtypeStruct((B, H), out_dtype),
        grid_spec=pl.GridSpec(
            grid=grid,
            in_specs=[
                pl.BlockSpec((block_b, D_in), lambda i: (i, 0)),  # x tile (streams)
                pl.BlockSpec((D_in, H), lambda i: (0, 0)),        # W1 (resident)
                pl.BlockSpec((2, H), lambda i: (0, 0)),           # packed biases
                pl.BlockSpec((H, H), lambda i: (0, 0)),           # W2 (resident)
            ],
            out_specs=pl.BlockSpec((block_b, H), lambda i: (i, 0)),
        ),
        compiler_params=pltpu.CompilerParams(**compiler_kwargs),
        cost_estimate=cost,
    )(x, w1_bf, b_packed, w2_bf)


def reference(x, w1, b1, w2, b2):
    h = jnp.maximum(x @ w1 + b1, 0.0)
    return jnp.maximum(h @ w2 + b2, 0.0)


if __name__ == "__main__":
    # Small shapes consistent with the module:
    #   audio_input_dim=64, audio_hidden_dim=128, audio_layers=2, batch=8.
    # (At this size the run is pure launch-overhead-bound; the tiling logic
    # above targets the large-B regime.)
    B, D_IN, H = 8, 64, 128

    key = jax.random.PRNGKey(0)
    kx, k1, k2, k3, k4 = jax.random.split(key, 5)

    x = jax.random.normal(kx, (B, D_IN), dtype=jnp.float32)
    # Deterministic synthetic parameters (not a checkpoint load).
    w1 = jax.random.normal(k1, (D_IN, H), dtype=jnp.float32) * 0.05
    b1 = jax.random.normal(k2, (1, H), dtype=jnp.float32) * 0.05
    w2 = jax.random.normal(k3, (H, H), dtype=jnp.float32) * 0.05
    b2 = jax.random.normal(k4, (1, H), dtype=jnp.float32) * 0.05

    out = advanced_audio_encoder(x, w1, b1, w2, b2)
    out = jax.block_until_ready(out)

    ref = reference(x, w1, b1, w2, b2)
    assert out.shape == (B, H)
    assert out.dtype == jnp.float32
    # bf16 MXU operands with f32 accumulation: loosened tolerance vs f32 ref.
    assert jnp.allclose(out, ref, atol=2e-2, rtol=2e-2)

    print("KERNEL_OK")
</pallas_src>

<mosaic_0001>
module attributes {stable_mosaic.version = 11 : i64} {
  func.func @_mlp2_kernel(%arg0: i32, %arg1: memref<8x64xf32, #tpu.memory_space<vmem>>, %arg2: memref<64x128xbf16, #tpu.memory_space<vmem>>, %arg3: memref<2x128xf32, #tpu.memory_space<vmem>>, %arg4: memref<128x128xbf16, #tpu.memory_space<vmem>>, %arg5: memref<8x128xf32, #tpu.memory_space<vmem>>) attributes {dimension_semantics = [#tpu.dimension_semantics<parallel>], iteration_bounds = array<i64: 1>, scalar_prefetch = 0 : i64, scratch_operands = 0 : i64, tpu.core_type = #tpu.core_type<tc>, window_params = [{transform_indices = @transform_0, window_bounds = array<i64: 8, 64>}, {pipeline_mode = #tpu.pipeline_mode<synchronous>, transform_indices = @transform_1, window_bounds = array<i64: 64, 128>}, {pipeline_mode = #tpu.pipeline_mode<synchronous>, transform_indices = @transform_2, window_bounds = array<i64: 2, 128>}, {pipeline_mode = #tpu.pipeline_mode<synchronous>, transform_indices = @transform_3, window_bounds = array<i64: 128, 128>}, {transform_indices = @transform_4, window_bounds = array<i64: 8, 128>}]} {
    %c0 = arith.constant 0 : index
    %c0_0 = arith.constant 0 : index
    %0 = vector.load %arg1[%c0, %c0_0] : memref<8x64xf32, #tpu.memory_space<vmem>>, vector<8x64xf32>
    %1 = arith.truncf %0 : vector<8x64xf32> to vector<8x64xbf16>
    %c0_1 = arith.constant 0 : index
    %c0_2 = arith.constant 0 : index
    %2 = vector.load %arg2[%c0_1, %c0_2] : memref<64x128xbf16, #tpu.memory_space<vmem>>, vector<64x128xbf16>
    %cst = arith.constant dense<0.000000e+00> : vector<8x128xf32>
    %3 = tpu.matmul %1, %2, %cst {dimension_numbers = #tpu.dot_dimension_numbers<[1], [0], [0], [1], [0, 0, 1, 1], [], []>} : vector<8x64xbf16>, vector<64x128xbf16>, vector<8x128xf32> -> vector<8x128xf32>
    %c0_3 = arith.constant 0 : index
    %c0_4 = arith.constant 0 : index
    %4 = vector.load %arg3[%c0_3, %c0_4] : memref<2x128xf32, #tpu.memory_space<vmem>>, vector<1x128xf32>
    %5 = vector.broadcast %4 : vector<1x128xf32> to vector<8x128xf32>
    %6 = arith.addf %3, %5 : vector<8x128xf32>
    %cst_5 = arith.constant 0.000000e+00 : f32
    %7 = vector.broadcast %cst_5 : f32 to vector<8x128xf32>
    %8 = arith.maximumf %6, %7 : vector<8x128xf32>
    %9 = arith.truncf %8 : vector<8x128xf32> to vector<8x128xbf16>
    %c0_6 = arith.constant 0 : index
    %c0_7 = arith.constant 0 : index
    %10 = vector.load %arg4[%c0_6, %c0_7] : memref<128x128xbf16, #tpu.memory_space<vmem>>, vector<128x128xbf16>
    %cst_8 = arith.constant dense<0.000000e+00> : vector<8x128xf32>
    %11 = tpu.matmul %9, %10, %cst_8 {dimension_numbers = #tpu.dot_dimension_numbers<[1], [0], [0], [1], [0, 0, 1, 1], [], []>} : vector<8x128xbf16>, vector<128x128xbf16>, vector<8x128xf32> -> vector<8x128xf32>
    %c1 = arith.constant 1 : index
    %c0_9 = arith.constant 0 : index
    %12 = vector.load %arg3[%c1, %c0_9] : memref<2x128xf32, #tpu.memory_space<vmem>>, vector<1x128xf32>
    %13 = vector.broadcast %12 : vector<1x128xf32> to vector<8x128xf32>
    %14 = arith.addf %11, %13 : vector<8x128xf32>
    %cst_10 = arith.constant 0.000000e+00 : f32
    %15 = vector.broadcast %cst_10 : f32 to vector<8x128xf32>
    %16 = arith.maximumf %14, %15 : vector<8x128xf32>
    %c0_11 = arith.constant 0 : index
    %c0_12 = arith.constant 0 : index
    %17 = vector.load %arg5[%c0_11, %c0_12] : memref<8x128xf32, #tpu.memory_space<vmem>>, vector<8x128xf32>
    tpu.vector_store %arg5[%c0_11, %c0_12], %16 {strides = array<i32>} : memref<8x128xf32, #tpu.memory_space<vmem>>, vector<8x128xf32>,
    return
  }
  func.func @transform_0(%arg0: i32) -> (i32, i32) {
    %c0_i32 = arith.constant 0 : i32
    %c0_i32_0 = arith.constant 0 : i32
    return %arg0, %c0_i32 : i32, i32
  }
  func.func @transform_1(%arg0: i32) -> (i32, i32) {
    %c0_i32 = arith.constant 0 : i32
    %c0_i32_0 = arith.constant 0 : i32
    %c0_i32_1 = arith.constant 0 : i32
    return %c0_i32, %c0_i32_0 : i32, i32
  }
  func.func @transform_2(%arg0: i32) -> (i32, i32) {
    %c0_i32 = arith.constant 0 : i32
    %c0_i32_0 = arith.constant 0 : i32
    %c0_i32_1 = arith.constant 0 : i32
    return %c0_i32, %c0_i32_0 : i32, i32
  }
  func.func @transform_3(%arg0: i32) -> (i32, i32) {
    %c0_i32 = arith.constant 0 : i32
    %c0_i32_0 = arith.constant 0 : i32
    %c0_i32_1 = arith.constant 0 : i32
    return %c0_i32, %c0_i32_0 : i32, i32
  }
  func.func @transform_4(%arg0: i32) -> (i32, i32) {
    %c0_i32 = arith.constant 0 : i32
    %c0_i32_0 = arith.constant 0 : i32
    return %arg0, %c0_i32 : i32, i32
  }
}

</mosaic_0001>

<bundles_post_ra>
// kernel: tpu_custom_call.1
= control target key start
LH: loop header
LB: loop body
LE: loop exit
PB: predicated region body
PF: predicated region fallthrough
CT: control target
= control target key end

     0   :  { %9 = vsyncpa [#allocation3], 0  ;;  %s538_s0 = inlined_call_operand.hbm [shape: f32[8,64], index: 0, kind: input, shape index: {}]   ;;  %s539_s1 = inlined_call_operand.hbm [shape: bf16[64,128], index: 1, kind: input, shape index: {}]   ;;  %s540_s2 = inlined_call_operand.vmem [shape: f32[2,128], index: 2, kind: input, shape index: {}]   ;;  %s541_s3 = inlined_call_operand.hbm [shape: bf16[128,128], index: 3, kind: input, shape index: {}]   ;;  %s542_s4 = inlined_call_operand.hbm [shape: f32[8,128], index: 4, kind: output, shape index: {}]  }
   0x1   :  { %10 = vsyncpa [#allocation6], 0 }
   0x2   :  { %11 = vsyncpa [#allocation4], 0  ;;  %s445_s15 = smov [#allocation5]   ;;  %s351_s19 = scalar_lea.hbm %s539_s1, 512 }
   0x3   :  { %s27_s16 = sshll.u32 %s445_s15, 4  ;;  %p352_p0 = scmp.ne.s32.totalorder %s539_s1, %s351_s19  ;;  %s28_s16 = int_to_ptr.vmem [resolvable:$true] %s27_s16 }
   0x4   :  { %p355_p1 = scmp.lt.u32.totalorder %s351_s19, %s539_s1 }
   0x6   :  { %p357_p2 = pnand %p355_p1, %p352_p0 }
   0x8   :  { %360 = shalt.err (!%p357_p2)
}
   0x9   :  { %s361_s24 = scalar_lea.vmem %s28_s16, 512  ;;  %p366_p4 = scmp.lt.s32.totalorder %s28_s16, %s28_s16 }
   0xa   :  { %p362_p3 = scmp.ne.s32.totalorder %s28_s16, %s361_s24  ;;  %p367_p5 = scmp.lt.s32.totalorder %s361_s24, %s361_s24 }
   0xc   :  { %p368_p6 = por %p367_p5, %p366_p4 }
   0xe   :  { %p369_p7 = pnand %p368_p6, %p362_p3 }
  0x10   :  { %372 = shalt.err (!%p369_p7)
}
  0x11   :  { %s446_s25 = smov 64   ;;  %s447_s26 = smov 4  }
  0x12   :  { %33 = dma.hbm_to_vmem [thread:$0]  %s539_s1, 512, %s28_s16, [#allocation6], %s446_s25, %s446_s25, %s447_s26  }
  0x13   :  { %s448_s29 = smov [#allocation2]   ;;  %s449_s5 = smov [#allocation7]  }
  0x14   :  { %s18_s30 = sshll.u32 %s448_s29, 4  ;;  %s41_s6 = sshll.u32 %s449_s5, 4  ;;  %s19_s30 = int_to_ptr.vmem [resolvable:$true] %s18_s30  ;;  %s42_s6 = int_to_ptr.vmem [resolvable:$true] %s41_s6 }
  0x15   :  { %s373_s9 = scalar_lea.hbm %s538_s0, 128 }
  0x16   :  { %p374_p8 = scmp.ne.s32.totalorder %s538_s0, %s373_s9  ;;  %p377_p9 = scmp.lt.u32.totalorder %s373_s9, %s538_s0 }
  0x18   :  { %p379_p10 = pnand %p377_p9, %p374_p8 }
  0x1a   :  { %382 = shalt.err (!%p379_p10)
}
  0x1b   :  { %s383_s1 = scalar_lea.vmem %s19_s30, 128  ;;  %p388_p12 = scmp.lt.s32.totalorder %s19_s30, %s19_s30 }
  0x1c   :  { %p384_p11 = scmp.ne.s32.totalorder %s19_s30, %s383_s1  ;;  %p389_p13 = scmp.lt.s32.totalorder %s383_s1, %s383_s1 }
  0x1e   :  { %p390_p0 = por %p389_p13, %p388_p12 }
  0x20   :  { %p391_p1 = pnand %p390_p0, %p384_p11 }
  0x22   :  { %394 = shalt.err (!%p391_p1)
}
  0x23   :  { %21 = dma.hbm_to_vmem [thread:$0]  %s538_s0, 128, %s19_s30, [#allocation3]  }
  0x24   :  { %s395_s18 = scalar_lea.hbm %s541_s3, 1024 }
  0x25   :  { %p396_p2 = scmp.ne.s32.totalorder %s541_s3, %s395_s18  ;;  %p399_p3 = scmp.lt.u32.totalorder %s395_s18, %s541_s3 }
  0x27   :  { %p401_p4 = pnand %p399_p3, %p396_p2 }
  0x29   :  { %404 = shalt.err (!%p401_p4)
}
  0x2a   :  { %s405_s23 = scalar_lea.vmem %s42_s6, 1024  ;;  %p410_p6 = scmp.lt.s32.totalorder %s42_s6, %s42_s6 }
  0x2b   :  { %p406_p5 = scmp.ne.s32.totalorder %s42_s6, %s405_s23  ;;  %p411_p7 = scmp.lt.s32.totalorder %s405_s23, %s405_s23 }
  0x2d   :  { %p412_p8 = por %p411_p7, %p410_p6 }
  0x2f   :  { %p413_p9 = pnand %p412_p8, %p406_p5 }
  0x31   :  { %416 = shalt.err (!%p413_p9)
}
  0x32   :  { %47 = dma.hbm_to_vmem [thread:$0]  %s541_s3, 1024, %s42_s6, [#allocation6], %s446_s25, %s446_s25, %s447_s26  }
  0x33   :  { %439 = dma.done.wait [#allocation3], 128  }
  0x34   :  { %440 = vsyncadd [#allocation3], 4294967168 }
  0x35   :  { %441 = dma.done.wait [#allocation6], 1536  }
  0x36   :  { %442 = vsyncadd [#allocation6], 4294965760  ;;  %v450_v0 = vmov 0.0   ;;  %vm451_vm0 = vmmov 0   ;;  %v339_v1 = vld [vmem:[#allocation5] sm:$0xff]   ;;  %v340_v2 = vld [vmem:[#allocation5 + $0x8] sm:$0xff]  }
  0x37   :  { %299 = vmatprep.subr.bf16.mxu0 %v450_v0  ;;  %307 = vmatprep.mubr.msk.bf16.mxu0 %vm451_vm0, %v450_v0  ;;  %v343_v3 = vld [vmem:[#allocation7] sm:$0xff]   ;;  %v341_v4 = vld [vmem:[#allocation5 + $0x10] sm:$0xff]   ;;  %v344_v5 = vld [vmem:[#allocation7 + $0x8] sm:$0xff]   ;;  %vm97_vm1 = vcmask 523264   ;;  %s452_s28 = smov [#allocation8]  }
  0x38   :  { %311 = vmatprep.subr.bf16.mxu1 %v450_v0  ;;  %327 = vmatprep.mubr.msk.bf16.mxu1 %vm451_vm0, %v450_v0  ;;  %v342_v6 = vld [vmem:[#allocation5 + $0x18] sm:$0xff]   ;;  %v345_v8 = vld [vmem:[#allocation7 + $0x10] sm:$0xff]   ;;  %v347_v11 = vld [vmem:[#allocation7 + $0x20] sm:$0xff]   ;;  %s260_s29 = sshll.u32 %s452_s28, 4  ;;  %s261_s29 = int_to_ptr.vmem [resolvable:$true] %s260_s29 }
  0x39   :  { %300 = vmatpush3.bf16.msra.mxu0 %v339_v1  ;;  %312 = vmatpush3.bf16.msra.mxu1 %v343_v3  ;;  %v58_v7 = vld [vmem:[#allocation2] sm:$0xff]  ;;  %v348_v12 = vld [vmem:[#allocation7 + $0x28] sm:$0xff]   ;;  %v349_v13 = vld [vmem:[#allocation7 + $0x30] sm:$0xff]   ;;  %s417_s30 = scalar_lea.vmem %s261_s29, 128  ;;  %p422_p11 = scmp.lt.s32.totalorder %s261_s29, %s261_s29 }
  0x3a   :  { %301 = vmatprep.subr.bf16.mxu0 %v450_v0  ;;  %313 = vmatprep.subr.bf16.mxu1 %v450_v0  ;;  %v59_v9 = vpack.c.bf16 %v58_v7, %v58_v7  ;;  %v346_v10 = vld [vmem:[#allocation7 + $0x18] sm:$0xff]   ;;  %p418_p10 = scmp.ne.s32.totalorder %s261_s29, %s417_s30  ;;  %p423_p12 = scmp.lt.s32.totalorder %s417_s30, %s417_s30 }
  0x3b   :  { %v350_v14 = vld [vmem:[#allocation7 + $0x38] sm:$0xff]  }
  0x3c   :  { %v270_v15 = vld [vmem:[%s540_s2] ss:$0 sm:$0xff]  ;;  %v276_v23 = vld [vmem:[%s540_s2 + $0x1] ss:$0 sm:$0xff]  ;;  %p424_p13 = por %p423_p12, %p422_p11 }
  0x3d   :  { %302 = vmatpush3.bf16.msra.mxu0 %v340_v2  ;;  %314 = vmatpush3.bf16.msra.mxu1 %v344_v5 }
  0x3e   :  { %303 = vmatprep.subr.bf16.mxu0 %v450_v0  ;;  %315 = vmatprep.subr.bf16.mxu1 %v450_v0  ;;  %p425_p0 = pnand %p424_p13, %p418_p10 }
  0x41   :  { %304 = vmatpush3.bf16.msra.mxu0 %v341_v4  ;;  %316 = vmatpush3.bf16.msra.mxu1 %v345_v8 }
  0x42   :  { %305 = vmatprep.subr.bf16.mxu0 %v450_v0  ;;  %317 = vmatprep.subr.bf16.mxu1 %v450_v0 }
  0x45   :  { %306 = vmatpush3.bf16.msra.mxu0 %v342_v6  ;;  %318 = vmatpush3.bf16.msra.mxu1 %v346_v10 }
  0x46   :  { %319 = vmatprep.subr.bf16.mxu1 %v450_v0 }
  0x48   :  { %308 = vmatmul.mubr.msk.bf16.vlgmr.msra.gmra.mrb[0].mxu0 %vm97_vm1, %v59_v9 }
  0x49   :  { %320 = vmatpush3.bf16.msra.mxu1 %v347_v11 }
  0x4a   :  { %321 = vmatprep.subr.bf16.mxu1 %v450_v0 }
  0x4d   :  { %322 = vmatpush3.bf16.msra.mxu1 %v348_v12 }
  0x4e   :  { %323 = vmatprep.subr.bf16.mxu1 %v450_v0 }
  0x51   :  { %324 = vmatpush3.bf16.msra.mxu1 %v349_v13 }
  0x52   :  { %325 = vmatprep.subr.bf16.mxu1 %v450_v0 }
  0x55   :  { %326 = vmatpush3.bf16.msra.mxu1 %v350_v14 }
 0x11b   :  { %v135_v16 = vpop.f32.mrb[0].mxu0 }
 0x11c   :  { %v136_v17 = vadd.f32 %v270_v15, %v135_v16  ;;  %v309_v18 = vpop.f32.mrb[1].mxu0 }
 0x11d   :  { %v138_v19 = vpop.f32.mrb[2].mxu0 }
 0x11e   :  { %v141_v20 = vmax.f32 %v136_v17, 0.0  ;;  %v310_v21 = vpop.f32.mrb[3].mxu0 }
 0x120   :  { %v142_v22 = vpack.c.bf16 %v141_v20, %v141_v20 }
 0x122   :  { %328 = vmatmul.mubr.bf16.vlgmr.msra.gmra.mrb[0].mxu1 %v142_v22 }
 0x1f5   :  { %v246_v24 = vpop.f32.mrb[0].mxu1 }
 0x1f6   :  { %v247_v25 = vadd.f32 %v276_v23, %v246_v24  ;;  %v329_v26 = vpop.f32.mrb[1].mxu1 }
 0x1f7   :  { %v249_v27 = vpop.f32.mrb[2].mxu1 }
 0x1f8   :  { %v252_v28 = vmax.f32 %v247_v25, 0.0  ;;  %v330_v29 = vpop.f32.mrb[3].mxu1 }
 0x1fa   :  { %253 = vst [vmem:[#allocation8] sm:$0xff] %v252_v28 }
 0x1fb   :  { %428 = shalt.err (!%p425_p0)
}
 0x1fc   :  { %s429_s2 = scalar_lea.hbm %s542_s4, 128 }
 0x1fd   :  { %p430_p1 = scmp.ne.s32.totalorder %s542_s4, %s429_s2  ;;  %p433_p2 = scmp.lt.u32.totalorder %s429_s2, %s542_s4 }
 0x1ff   :  { %p435_p3 = pnand %p433_p2, %p430_p1 }
 0x201   :  { %438 = shalt.err (!%p435_p3)
}
 0x202   :  { %263 = dma.vmem_to_hbm [thread:$0]  %s261_s29, 128, %s542_s4, [#allocation4]  }
 0x203   :  { %443 = dma.done.wait [#allocation4], 128  }
 0x204   :  { %444 = vsyncadd [#allocation4], 4294967168 }
 0x205   :  { %267 = vsyncpa [#allocation3], 1 }
 0x206   :  { %268 = vsyncpa [#allocation6], 1 }
 0x207   :  { %269 = vsyncpa [#allocation4], 1 }

</bundles_post_ra>
